<compile_context>
chip_gen: v5e
topology: v5e:2x2
jax: 0.10.0
libtpu: 0.0.40
codegen_flags: <defaults>
</compile_context>

<pallas_src>
import jax
import jax.numpy as jnp
from jax.experimental import pallas as pl
from jax.experimental.pallas import tpu as pltpu


def _round_up(n, m):
    return ((n + m - 1) // m) * m


def _num_tensorcores():
    """Best-effort detection of TensorCores per chip (2 on v7x, else 1)."""
    try:
        kind = jax.devices()[0].device_kind.lower()
    except Exception:  # pragma: no cover - defensive
        return 1
    return 2 if ("v7" in kind or "7x" in kind) else 1


def _fused_mlp_kernel(x_ref, w_ref, b_ref, o_ref):
    """All LinearBlocks fused: h = relu(h @ W_l + b_l) for l in range(L)."""
    num_layers = w_ref.shape[0]        # static at trace time
    cdt = w_ref.dtype                  # MXU operand dtype (f32 or bf16)

    def layer(l, h):
        a = h if h.dtype == cdt else h.astype(cdt)
        y = jnp.dot(a, w_ref[l], preferred_element_type=jnp.float32)
        y = y + b_ref[l].astype(jnp.float32)   # (1, D) broadcast over rows
        return jnp.maximum(y, 0.0)             # relu on every layer (incl. last)

    if num_layers <= 4:
        # Small L (MUNIT case): unroll, weights stay resident in VMEM.
        h = x_ref[...]
        for l in range(num_layers):
            h = layer(l, h)
    else:
        # Large L: dynamic indexing keeps one layer's weights live at a time.
        h = jax.lax.fori_loop(0, num_layers, layer,
                              x_ref[...].astype(jnp.float32))
    o_ref[...] = h.astype(o_ref.dtype)


def pack_mlp_params(params, compute_dtype=jnp.float32):
    """Zero-pad every layer to a common lane-dense width D (mult. of 128) and
    stack into single (L, D, D) weight and (L, 1, D) bias operands.
    Do this ONCE per parameter set, not per forward call."""
    dims = [params[0][0].shape[0]] + [w.shape[1] for (w, _) in params]
    D = _round_up(max(dims), 128)
    w_stack = jnp.stack([
        jnp.pad(w, ((0, D - w.shape[0]), (0, D - w.shape[1])))
        for (w, _) in params
    ]).astype(compute_dtype)
    b_stack = jnp.stack([
        jnp.pad(b, ((0, 0), (0, D - b.shape[1])))
        for (_, b) in params
    ]).astype(compute_dtype)
    out_dim = dims[-1]
    return w_stack, b_stack, out_dim


def fused_mlp(x, w_stack, b_stack, out_dim):
    """x: [B, in_dim] (already flattened). Returns [B, out_dim]."""
    B, in_dim = x.shape
    L, D, _ = w_stack.shape
    assert in_dim <= D

    # ---- batch tiling -------------------------------------------------
    # Pad to f32 sublane multiple; pick a tile so that
    #   * per-step overhead stays negligible (big tiles, >=512 for big B),
    #   * on 2-TC chips (v7x) there are >=2 grid steps so the "parallel"
    #     batch axis shards across both TensorCores.
    pB = _round_up(max(B, 8), 8)
    cores = _num_ensorcores() if False else _num_tensorcores()
    if pB > 512:
        bB = 512
        pB = _round_up(pB, bB)
    elif cores >= 2 and pB >= 16:
        bB = _round_up(pB // 2, 8)
        pB = _round_up(pB, bB)
    else:
        bB = pB
    grid = (pB // bB,)

    x_pad = jnp.pad(x, ((0, pB - B), (0, D - in_dim)))

    # ---- VMEM budget (only matters once the weight stack gets big) -----
    itemsize = jnp.dtype(w_stack.dtype).itemsize
    est = (2 * w_stack.size + 2 * b_stack.size + 4 * bB * D) * itemsize
    est += 2 << 20  # headroom
    cp_kwargs = dict(dimension_semantics=("parallel",))
    if est > 24 * 1024 * 1024:
        cp_kwargs["vmem_limit_bytes"] = min(int(est), 64 * 1024 * 1024)

    vmem = pltpu.MemorySpace.VMEM
    out_pad = pl.pallas_call(
        _fused_mlp_kernel,
        out_shape=jax.ShapeDtypeStruct((pB, D), x.dtype),
        grid=grid,
        in_specs=[
            pl.BlockSpec((bB, D), lambda i: (i, 0), memory_space=vmem),
            # Constant index_map: stacked weights/biases stay resident.
            pl.BlockSpec((L, D, D), lambda i: (0, 0, 0), memory_space=vmem),
            pl.BlockSpec((L, 1, D), lambda i: (0, 0, 0), memory_space=vmem),
        ],
        out_specs=pl.BlockSpec((bB, D), lambda i: (i, 0), memory_space=vmem),
        compiler_params=pltpu.CompilerParams(**cp_kwargs),
    )(x_pad, w_stack, b_stack)

    return out_pad[:B, :out_dim]


def _num_ensorcores():  # kept only so the guarded call above never triggers
    return 1


def make_mlp_forward(params, compute_dtype=jnp.float32):
    """Pack parameters ONCE, return a jitted forward: x -> MLP(x)."""
    w_stack, b_stack, out_dim = pack_mlp_params(params, compute_dtype)

    @jax.jit
    def forward(x):
        B = x.shape[0]
        h = x.reshape(B, -1)            # == x.view(B, -1)
        return fused_mlp(h, w_stack, b_stack, out_dim)

    return forward


def init_mlp_params(key, input_dim, output_dim, latent_dim, num_layers,
                    dtype=jnp.float32):
    """Deterministic synthetic parameters with the same shapes as the module.
    Weights stored as [in_dim, out_dim] (== torch weight.T)."""
    dims = [input_dim] + [latent_dim] * (num_layers - 1) + [output_dim]
    params = []
    for i in range(num_layers):
        key, kw, kb = jax.random.split(key, 3)
        fan_in, fan_out = dims[i], dims[i + 1]
        scale = 1.0 / jnp.sqrt(jnp.asarray(fan_in, dtype))
        w = jax.random.uniform(kw, (fan_in, fan_out), dtype, -scale, scale)
        b = jax.random.uniform(kb, (1, fan_out), dtype, -scale, scale)
        params.append((w, b))
    return params


if __name__ == "__main__":
    # MUNIT style-MLP shapes, kept small: style code of dim 8,
    # latent_dim 32, output_dim 32, 3 layers, batch 2.
    input_dim, output_dim, latent_dim, num_layers = 8, 32, 32, 3
    batch = 2

    key = jax.random.PRNGKey(0)
    key, kx = jax.random.split(key)
    # style code input, e.g. (B, input_dim, 1, 1) in torch; view() flattens it
    x = jax.random.normal(kx, (batch, input_dim, 1, 1), jnp.float32)

    params = init_mlp_params(key, input_dim, output_dim, latent_dim,
                             num_layers)

    forward = make_mlp_forward(params)          # pack + jit once
    out = jax.block_until_ready(forward(x))

    # quick sanity check against plain-JAX reference (unpadded params)
    h_ref = x.reshape(batch, -1)
    for (w, b) in params:
        h_ref = jnp.maximum(h_ref @ w + b, 0.0)
    assert out.shape == (batch, output_dim)
    assert jnp.allclose(out, h_ref, atol=1e-5, rtol=1e-5)

    print("KERNEL_OK")
</pallas_src>

<mosaic_0001>
module attributes {stable_mosaic.version = 11 : i64} {
  func.func @_fused_mlp_kernel(%arg0: i32, %arg1: memref<8x128xf32, #tpu.memory_space<vmem>>, %arg2: memref<3x128x128xf32, #tpu.memory_space<vmem>>, %arg3: memref<3x1x128xf32, #tpu.memory_space<vmem>>, %arg4: memref<8x128xf32, #tpu.memory_space<vmem>>) attributes {dimension_semantics = [#tpu.dimension_semantics<parallel>], iteration_bounds = array<i64: 1>, scalar_prefetch = 0 : i64, scratch_operands = 0 : i64, tpu.core_type = #tpu.core_type<tc>, window_params = [{transform_indices = @transform_0, window_bounds = array<i64: 8, 128>}, {pipeline_mode = #tpu.pipeline_mode<synchronous>, transform_indices = @transform_1, window_bounds = array<i64: 3, 128, 128>}, {pipeline_mode = #tpu.pipeline_mode<synchronous>, transform_indices = @transform_2, window_bounds = array<i64: 3, 1, 128>}, {transform_indices = @transform_3, window_bounds = array<i64: 8, 128>}]} {
    %c0 = arith.constant 0 : index
    %c0_0 = arith.constant 0 : index
    %0 = vector.load %arg1[%c0, %c0_0] : memref<8x128xf32, #tpu.memory_space<vmem>>, vector<8x128xf32>
    %c0_1 = arith.constant 0 : index
    %c0_2 = arith.constant 0 : index
    %c0_3 = arith.constant 0 : index
    %1 = vector.load %arg2[%c0_1, %c0_2, %c0_3] : memref<3x128x128xf32, #tpu.memory_space<vmem>>, vector<1x128x128xf32>
    %2 = vector.shape_cast %1 : vector<1x128x128xf32> to vector<128x128xf32>
    %cst = arith.constant dense<0.000000e+00> : vector<8x128xf32>
    %3 = tpu.matmul %0, %2, %cst {dimension_numbers = #tpu.dot_dimension_numbers<[1], [0], [0], [1], [0, 0, 1, 1], [], []>} : vector<8x128xf32>, vector<128x128xf32>, vector<8x128xf32> -> vector<8x128xf32>
    %c0_4 = arith.constant 0 : index
    %c0_5 = arith.constant 0 : index
    %c0_6 = arith.constant 0 : index
    %4 = vector.load %arg3[%c0_4, %c0_5, %c0_6] : memref<3x1x128xf32, #tpu.memory_space<vmem>>, vector<1x1x128xf32>
    %5 = vector.shape_cast %4 : vector<1x1x128xf32> to vector<1x128xf32>
    %6 = vector.broadcast %5 : vector<1x128xf32> to vector<8x128xf32>
    %7 = arith.addf %3, %6 : vector<8x128xf32>
    %cst_7 = arith.constant 0.000000e+00 : f32
    %8 = vector.broadcast %cst_7 : f32 to vector<8x128xf32>
    %9 = arith.maximumf %7, %8 : vector<8x128xf32>
    %c1 = arith.constant 1 : index
    %c0_8 = arith.constant 0 : index
    %c0_9 = arith.constant 0 : index
    %10 = vector.load %arg2[%c1, %c0_8, %c0_9] : memref<3x128x128xf32, #tpu.memory_space<vmem>>, vector<1x128x128xf32>
    %11 = vector.shape_cast %10 : vector<1x128x128xf32> to vector<128x128xf32>
    %cst_10 = arith.constant dense<0.000000e+00> : vector<8x128xf32>
    %12 = tpu.matmul %9, %11, %cst_10 {dimension_numbers = #tpu.dot_dimension_numbers<[1], [0], [0], [1], [0, 0, 1, 1], [], []>} : vector<8x128xf32>, vector<128x128xf32>, vector<8x128xf32> -> vector<8x128xf32>
    %c1_11 = arith.constant 1 : index
    %c0_12 = arith.constant 0 : index
    %c0_13 = arith.constant 0 : index
    %13 = vector.load %arg3[%c1_11, %c0_12, %c0_13] : memref<3x1x128xf32, #tpu.memory_space<vmem>>, vector<1x1x128xf32>
    %14 = vector.shape_cast %13 : vector<1x1x128xf32> to vector<1x128xf32>
    %15 = vector.broadcast %14 : vector<1x128xf32> to vector<8x128xf32>
    %16 = arith.addf %12, %15 : vector<8x128xf32>
    %cst_14 = arith.constant 0.000000e+00 : f32
    %17 = vector.broadcast %cst_14 : f32 to vector<8x128xf32>
    %18 = arith.maximumf %16, %17 : vector<8x128xf32>
    %c2 = arith.constant 2 : index
    %c0_15 = arith.constant 0 : index
    %c0_16 = arith.constant 0 : index
    %19 = vector.load %arg2[%c2, %c0_15, %c0_16] : memref<3x128x128xf32, #tpu.memory_space<vmem>>, vector<1x128x128xf32>
    %20 = vector.shape_cast %19 : vector<1x128x128xf32> to vector<128x128xf32>
    %cst_17 = arith.constant dense<0.000000e+00> : vector<8x128xf32>
    %21 = tpu.matmul %18, %20, %cst_17 {dimension_numbers = #tpu.dot_dimension_numbers<[1], [0], [0], [1], [0, 0, 1, 1], [], []>} : vector<8x128xf32>, vector<128x128xf32>, vector<8x128xf32> -> vector<8x128xf32>
    %c2_18 = arith.constant 2 : index
    %c0_19 = arith.constant 0 : index
    %c0_20 = arith.constant 0 : index
    %22 = vector.load %arg3[%c2_18, %c0_19, %c0_20] : memref<3x1x128xf32, #tpu.memory_space<vmem>>, vector<1x1x128xf32>
    %23 = vector.shape_cast %22 : vector<1x1x128xf32> to vector<1x128xf32>
    %24 = vector.broadcast %23 : vector<1x128xf32> to vector<8x128xf32>
    %25 = arith.addf %21, %24 : vector<8x128xf32>
    %cst_21 = arith.constant 0.000000e+00 : f32
    %26 = vector.broadcast %cst_21 : f32 to vector<8x128xf32>
    %27 = arith.maximumf %25, %26 : vector<8x128xf32>
    %c0_22 = arith.constant 0 : index
    %c0_23 = arith.constant 0 : index
    %28 = vector.load %arg4[%c0_22, %c0_23] : memref<8x128xf32, #tpu.memory_space<vmem>>, vector<8x128xf32>
    tpu.vector_store %arg4[%c0_22, %c0_23], %27 {strides = array<i32>} : memref<8x128xf32, #tpu.memory_space<vmem>>, vector<8x128xf32>,
    return
  }
  func.func @transform_0(%arg0: i32) -> (i32, i32) {
    %c0_i32 = arith.constant 0 : i32
    %c0_i32_0 = arith.constant 0 : i32
    return %arg0, %c0_i32 : i32, i32
  }
  func.func @transform_1(%arg0: i32) -> (i32, i32, i32) {
    %c0_i32 = arith.constant 0 : i32
    %c0_i32_0 = arith.constant 0 : i32
    %c0_i32_1 = arith.constant 0 : i32
    %c0_i32_2 = arith.constant 0 : i32
    return %c0_i32, %c0_i32_0, %c0_i32_1 : i32, i32, i32
  }
  func.func @transform_2(%arg0: i32) -> (i32, i32, i32) {
    %c0_i32 = arith.constant 0 : i32
    %c0_i32_0 = arith.constant 0 : i32
    %c0_i32_1 = arith.constant 0 : i32
    %c0_i32_2 = arith.constant 0 : i32
    return %c0_i32, %c0_i32_0, %c0_i32_1 : i32, i32, i32
  }
  func.func @transform_3(%arg0: i32) -> (i32, i32) {
    %c0_i32 = arith.constant 0 : i32
    %c0_i32_0 = arith.constant 0 : i32
    return %arg0, %c0_i32 : i32, i32
  }
}

</mosaic_0001>

<bundles_post_ra>
// kernel: forward.1
= control target key start
LH: loop header
LB: loop body
LE: loop exit
PB: predicated region body
PF: predicated region fallthrough
CT: control target
= control target key end

     0   :  { %8 = vsyncpa [#allocation3], 0  ;;  %s198_s15 = smov [#allocation2]   ;;  %s199_s17 = smov 128   ;;  %s239_s0 = inlined_call_operand.vmem [shape: f32[8,128], index: 0, kind: input, shape index: {}]   ;;  %s240_s1 = inlined_call_operand.hbm [shape: f32[3,128,128], index: 1, kind: input, shape index: {}]   ;;  %s241_s2 = inlined_call_operand.vmem [shape: f32[3,1,128], index: 2, kind: input, shape index: {}]   ;;  %s242_s3 = inlined_call_operand.vmem [shape: f32[8,128], index: 3, kind: output, shape index: {}]  }
   0x1   :  { %s15_s14 = sshll.u32 %s240_s1, 4  ;;  %s17_s16 = sshll.u32 %s198_s15, 4  ;;  %s16_s14 = int_to_ptr.hbm [resolvable:$true] %s15_s14  ;;  %s18_s16 = int_to_ptr.vmem [resolvable:$true] %s17_s16 }
   0x2   :  { %s200_s18 = smov 8  }
   0x3   :  { %23 = dma.hbm_to_vmem [thread:$0]  %s16_s14, 6144, %s18_s16, [#allocation3], %s199_s17, %s199_s17, %s200_s18  }
   0x4   :  { %196 = dma.done.wait [#allocation3], 6144  }
   0x5   :  { %197 = vsyncadd [#allocation3], 4294961152  ;;  %v46_v0 = vld [vmem:[#allocation2 + $0x78] sm:$0xff]  ;;  %v45_v1 = vld [vmem:[#allocation2 + $0x70] sm:$0xff] }
   0x6   :  { %51 = vmatpush.msra.mxu0 %v46_v0  ;;  %v44_v2 = vld [vmem:[#allocation2 + $0x68] sm:$0xff]  ;;  %v43_v3 = vld [vmem:[#allocation2 + $0x60] sm:$0xff]  ;;  %v88_v4 = vld [vmem:[#allocation2 + $0xf8] sm:$0xff] }
   0x7   :  { %v42_v5 = vld [vmem:[#allocation2 + $0x58] sm:$0xff]  ;;  %94 = vmatpush.msra.mxu1 %v88_v4  ;;  %v87_v6 = vld [vmem:[#allocation2 + $0xf0] sm:$0xff]  ;;  %v86_v7 = vld [vmem:[#allocation2 + $0xe8] sm:$0xff] }
   0x8   :  { %52 = vmatpush.msra.mxu0 %v45_v1  ;;  %v41_v8 = vld [vmem:[#allocation2 + $0x50] sm:$0xff]  ;;  %v85_v9 = vld [vmem:[#allocation2 + $0xe0] sm:$0xff]  ;;  %v40_v10 = vld [vmem:[#allocation2 + $0x48] sm:$0xff] }
   0x9   :  { %95 = vmatpush.msra.mxu1 %v87_v6  ;;  %v84_v11 = vld [vmem:[#allocation2 + $0xd8] sm:$0xff]  ;;  %v39_v12 = vld [vmem:[#allocation2 + $0x40] sm:$0xff]  ;;  %v83_v13 = vld [vmem:[#allocation2 + $0xd0] sm:$0xff] }
   0xa   :  { %53 = vmatpush.msra.mxu0 %v44_v2  ;;  %v38_v14 = vld [vmem:[#allocation2 + $0x38] sm:$0xff]  ;;  %v82_v15 = vld [vmem:[#allocation2 + $0xc8] sm:$0xff]  ;;  %v37_v16 = vld [vmem:[#allocation2 + $0x30] sm:$0xff] }
   0xb   :  { %96 = vmatpush.msra.mxu1 %v86_v7  ;;  %v81_v17 = vld [vmem:[#allocation2 + $0xc0] sm:$0xff]  ;;  %v36_v18 = vld [vmem:[#allocation2 + $0x28] sm:$0xff]  ;;  %v80_v19 = vld [vmem:[#allocation2 + $0xb8] sm:$0xff] }
   0xc   :  { %54 = vmatpush.msra.mxu0 %v43_v3  ;;  %v35_v20 = vld [vmem:[#allocation2 + $0x20] sm:$0xff]  ;;  %v79_v21 = vld [vmem:[#allocation2 + $0xb0] sm:$0xff]  ;;  %v34_v22 = vld [vmem:[#allocation2 + $0x18] sm:$0xff] }
   0xd   :  { %97 = vmatpush.msra.mxu1 %v85_v9  ;;  %v78_v23 = vld [vmem:[#allocation2 + $0xa8] sm:$0xff]  ;;  %v33_v24 = vld [vmem:[#allocation2 + $0x10] sm:$0xff]  ;;  %v77_v25 = vld [vmem:[#allocation2 + $0xa0] sm:$0xff] }
   0xe   :  { %55 = vmatpush.msra.mxu0 %v42_v5  ;;  %v32_v26 = vld [vmem:[#allocation2 + $0x8] sm:$0xff]  ;;  %v76_v27 = vld [vmem:[#allocation2 + $0x98] sm:$0xff]  ;;  %v31_v28 = vld [vmem:[#allocation2] sm:$0xff] }
   0xf   :  { %98 = vmatpush.msra.mxu1 %v84_v11  ;;  %v30_v29 = vld [vmem:[%s239_s0] sm:$0xff]  ;;  %v75_v30 = vld [vmem:[#allocation2 + $0x90] sm:$0xff]  ;;  %v74_v31 = vld [vmem:[#allocation2 + $0x88] sm:$0xff] }
  0x10   :  { %56 = vmatpush.msra.mxu0 %v41_v8  ;;  %v73_v32 = vld [vmem:[#allocation2 + $0x80] sm:$0xff]  ;;  %v131_v33 = vld [vmem:[#allocation2 + $0x178] sm:$0xff]  ;;  %v130_v34 = vld [vmem:[#allocation2 + $0x170] sm:$0xff] }
  0x11   :  { %99 = vmatpush.msra.mxu1 %v83_v13  ;;  %137 = vmatpush.msra.mxu2 %v131_v33  ;;  %v129_v35 = vld [vmem:[#allocation2 + $0x168] sm:$0xff]  ;;  %v128_v36 = vld [vmem:[#allocation2 + $0x160] sm:$0xff]  ;;  %v127_v37 = vld [vmem:[#allocation2 + $0x158] sm:$0xff] }
  0x12   :  { %57 = vmatpush.msra.mxu0 %v40_v10  ;;  %v126_v38 = vld [vmem:[#allocation2 + $0x150] sm:$0xff]  ;;  %v125_v39 = vld [vmem:[#allocation2 + $0x148] sm:$0xff]  ;;  %v124_v40 = vld [vmem:[#allocation2 + $0x140] sm:$0xff] }
  0x13   :  { %100 = vmatpush.msra.mxu1 %v82_v15  ;;  %138 = vmatpush.msra.mxu2 %v130_v34  ;;  %v123_v41 = vld [vmem:[#allocation2 + $0x138] sm:$0xff]  ;;  %v122_v42 = vld [vmem:[#allocation2 + $0x130] sm:$0xff]  ;;  %v121_v43 = vld [vmem:[#allocation2 + $0x128] sm:$0xff] }
  0x14   :  { %58 = vmatpush.msra.mxu0 %v39_v12  ;;  %v120_v44 = vld [vmem:[#allocation2 + $0x120] sm:$0xff]  ;;  %v119_v45 = vld [vmem:[#allocation2 + $0x118] sm:$0xff]  ;;  %v118_v50 = vld [vmem:[#allocation2 + $0x110] sm:$0xff] }
  0x15   :  { %101 = vmatpush.msra.mxu1 %v81_v17  ;;  %139 = vmatpush.msra.mxu2 %v129_v35  ;;  %v169_v46 = vld [vmem:[%s241_s2] ss:$0 sm:$0xff]  ;;  %v117_v51 = vld [vmem:[#allocation2 + $0x108] sm:$0xff]  ;;  %v170_v53 = vld [vmem:[%s241_s2 + $0x1] ss:$0 sm:$0xff] }
  0x16   :  { %59 = vmatpush.msra.mxu0 %v38_v14  ;;  %v116_v52 = vld [vmem:[#allocation2 + $0x100] sm:$0xff] }
  0x17   :  { %102 = vmatpush.msra.mxu1 %v80_v19  ;;  %140 = vmatpush.msra.mxu2 %v128_v36  ;;  %v171_v57 = vld [vmem:[%s241_s2 + $0x2] ss:$0 sm:$0xff] }
  0x18   :  { %60 = vmatpush.msra.mxu0 %v37_v16 }
  0x19   :  { %103 = vmatpush.msra.mxu1 %v79_v21  ;;  %141 = vmatpush.msra.mxu2 %v127_v37 }
  0x1a   :  { %61 = vmatpush.msra.mxu0 %v36_v18 }
  0x1b   :  { %104 = vmatpush.msra.mxu1 %v78_v23  ;;  %142 = vmatpush.msra.mxu2 %v126_v38 }
  0x1c   :  { %62 = vmatpush.msra.mxu0 %v35_v20 }
  0x1d   :  { %105 = vmatpush.msra.mxu1 %v77_v25  ;;  %143 = vmatpush.msra.mxu2 %v125_v39 }
  0x1e   :  { %63 = vmatpush.msra.mxu0 %v34_v22 }
  0x1f   :  { %106 = vmatpush.msra.mxu1 %v76_v27  ;;  %144 = vmatpush.msra.mxu2 %v124_v40 }
  0x20   :  { %64 = vmatpush.msra.mxu0 %v33_v24 }
  0x21   :  { %107 = vmatpush.msra.mxu1 %v75_v30  ;;  %145 = vmatpush.msra.mxu2 %v123_v41 }
  0x22   :  { %65 = vmatpush.msra.mxu0 %v32_v26 }
  0x23   :  { %108 = vmatpush.msra.mxu1 %v74_v31  ;;  %146 = vmatpush.msra.mxu2 %v122_v42 }
  0x24   :  { %66 = vmatpush.msra.mxu0 %v31_v28 }
  0x25   :  { %67 = vmatmul.f32.vlgmr.msra.gmra.mxu0 %v30_v29  ;;  %109 = vmatpush.msra.mxu1 %v73_v32 }
  0x26   :  { %147 = vmatpush.msra.mxu2 %v121_v43 }
  0x28   :  { %148 = vmatpush.msra.mxu2 %v120_v44 }
  0x2a   :  { %149 = vmatpush.msra.mxu2 %v119_v45 }
  0x2c   :  { %150 = vmatpush.msra.mxu2 %v118_v50 }
  0x2e   :  { %151 = vmatpush.msra.mxu2 %v117_v51 }
  0x30   :  { %152 = vmatpush.msra.mxu2 %v116_v52 }
  0xa2   :  { %v68_v47 = vpop.f32.mrf.mxu0 }
  0xa3   :  { %v69_v48 = vadd.f32 %v169_v46, %v68_v47 }
  0xa5   :  { %v71_v49 = vmax.f32 %v69_v48, 0.0 }
  0xa7   :  { %110 = vmatmul.f32.vlgmr.msra.gmra.mxu1 %v71_v49 }
 0x124   :  { %v111_v54 = vpop.f32.mrf.mxu1 }
 0x125   :  { %v112_v55 = vadd.f32 %v170_v53, %v111_v54 }
 0x127   :  { %v114_v56 = vmax.f32 %v112_v55, 0.0 }
 0x129   :  { %153 = vmatmul.f32.vlgmr.msra.gmra.mxu2 %v114_v56 }
 0x1ac   :  { %v154_v58 = vpop.f32.mrf.mxu2 }
 0x1ad   :  { %v155_v59 = vadd.f32 %v171_v57, %v154_v58 }
 0x1af   :  { %v157_v60 = vmax.f32 %v155_v59, 0.0 }
 0x1b1   :  { %158 = vst [vmem:[%s242_s3] sm:$0xff] %v157_v60 }
 0x1b2   :  { %163 = vsyncpa [#allocation3], 1 }

</bundles_post_ra>
